<compile_context>
chip_gen: v6e
topology: v6e:2x2x1
jax: 0.10.0
libtpu: 0.0.40
codegen_flags: <defaults>
</compile_context>

<pallas_src>
import numpy as np
import jax
import jax.numpy as jnp
from jax.experimental import pallas as pl
from jax.experimental.pallas import tpu as pltpu

C_IN = 100        # Conv1d in_channels
L = 52            # sequence length implied by the pooling windows (51/50/49 -> 1)
LPAD = 64         # per-sample lane stride inside a packed block (52 padded to 64)
N_FILT = 20       # Conv1d out_channels
L1 = L - 1        # 51 = conv1 (k=2) output length, pooled with kernel 51
L2 = L - 2        # 50 = conv2 (k=3) output length, pooled with kernel 50 and 49
N_CLASSES = 5


def net_kernel(x_ref, w_ref, b_ref, fc_ref, o_ref):
    # x_ref : (100, spb*64)  spb lane-packed samples (cols [s*64, s*64+52) real, rest zero pad)
    # w_ref : (100, 100)     rows 0:20/20:40 = conv1 taps 0,1 ; rows 40:60/60:80/80:100 = conv2 taps 0,1,2
    # b_ref : (40, 1)        rows 0:20 = b1, rows 20:40 = b2
    # fc_ref: (61, 5)        rows 0:60 = fc1.weight.T, row 60 = fc1.bias
    # o_ref : (1, spb, 5)
    spb = o_ref.shape[1]

    # one fused MXU push for all conv taps and all spb samples in this block
    P = jnp.dot(w_ref[...], x_ref[...], preferred_element_type=jnp.float32)

    b1 = b_ref[0:N_FILT, :]                        # (20, 1)
    b2 = b_ref[N_FILT:2 * N_FILT, :]               # (20, 1)
    wfcT = fc_ref[0:3 * N_FILT, :]                 # (60, 5)
    bfc = fc_ref[3 * N_FILT:3 * N_FILT + 1, :]     # (1, 5)

    for s in range(spb):                           # static unroll, spb <= 4
        c0 = s * LPAD

        # conv1 (k=2): shifted-tap VPU adds on exact-size slices of P (no padded lanes included)
        s1 = P[0:20, c0:c0 + L1] + P[20:40, c0 + 1:c0 + 1 + L1] + b1
        r1 = jnp.maximum(s1, 0.0)
        m1 = jnp.max(r1, axis=1, keepdims=True)                # max_pool1d(51) -> (20,1)

        # conv2 (k=3): used twice in forward() (x2 and x3)
        s2 = (P[40:60, c0:c0 + L2] + P[60:80, c0 + 1:c0 + 1 + L2]
              + P[80:100, c0 + 2:c0 + 2 + L2] + b2)
        r2 = jnp.maximum(s2, 0.0)
        m2 = jnp.max(r2, axis=1, keepdims=True)                # max_pool1d(50) -> (20,1)
        m3 = jnp.max(r2[:, 0:L2 - 1], axis=1, keepdims=True)   # max_pool1d(49): single window [0,49)

        # fc1 on the VPU (no MXU): logits = fc1.weight @ [m1;m2;m3] + bias, as slab-muls + sublane reduce
        part = wfcT[0:20, :] * m1 + wfcT[20:40, :] * m2 + wfcT[40:60, :] * m3   # (20, 5)
        logits = jnp.sum(part, axis=0, keepdims=True) + bfc                     # (1, 5)

        # softmax over the 5 classes; reciprocal goes to the EUP slot
        z = logits - jnp.max(logits, axis=1, keepdims=True)
        e = jnp.exp(z)
        inv = pl.reciprocal(jnp.sum(e, axis=1, keepdims=True), approx=True)
        o_ref[0, s:s + 1, :] = e * inv


def pack_params(params):
    """Host-side, once-per-model packing (hoisted out of the per-call path)."""
    w1, b1, w2, b2, wfc, bfc = [jnp.asarray(p, jnp.float32) for p in params]
    w_all = jnp.concatenate(
        [w1[:, :, 0], w1[:, :, 1], w2[:, :, 0], w2[:, :, 1], w2[:, :, 2]], axis=0)   # (100, 100)
    b_all = jnp.concatenate([b1, b2], axis=0).reshape(2 * N_FILT, 1)                 # (40, 1)
    fc_all = jnp.concatenate([wfc.T, bfc.reshape(1, N_CLASSES)], axis=0)             # (61, 5)
    return w_all, b_all, fc_all


def _forward_batched(xb, w_all, b_all, fc_all, *, spb):
    B = xb.shape[0]
    bp = ((B + spb - 1) // spb) * spb
    # lane-pack: (B,100,52) -> zero-pad each sample to 64 lanes -> (100, bp*64)
    xp = jnp.zeros((bp, C_IN, LPAD), jnp.float32).at[:B, :, :L].set(xb.astype(jnp.float32))
    xlane = jnp.transpose(xp, (1, 0, 2)).reshape(C_IN, bp * LPAD)
    nblk = bp // spb
    out = pl.pallas_call(
        net_kernel,
        out_shape=jax.ShapeDtypeStruct((nblk, spb, N_CLASSES), jnp.float32),
        grid=(nblk,),
        in_specs=[
            pl.BlockSpec((C_IN, spb * LPAD), lambda b: (0, b)),        # spb samples per block
            pl.BlockSpec((C_IN, C_IN), lambda b: (0, 0)),              # weights stay VMEM-resident
            pl.BlockSpec((2 * N_FILT, 1), lambda b: (0, 0)),
            pl.BlockSpec((3 * N_FILT + 1, N_CLASSES), lambda b: (0, 0)),
        ],
        out_specs=pl.BlockSpec((1, spb, N_CLASSES), lambda b: (b, 0, 0)),
        compiler_params=pltpu.CompilerParams(dimension_semantics=("parallel",)),
    )(xlane, w_all, b_all, fc_all)
    return out.reshape(bp, N_CLASSES)[:B]


_forward_batched_jit = jax.jit(_forward_batched, static_argnames=("spb",))


def net_forward_batched(xb, packed, spb=2):
    # spb=2 -> 128 lanes per MXU push (fills a v5e pass); use spb=4 on v6e/v7x (256-wide MXU).
    w_all, b_all, fc_all = packed
    return _forward_batched_jit(xb, w_all, b_all, fc_all, spb=spb)


def net_forward(x, packed):
    """Unbatched forward matching the PyTorch module: x is (100, 52) -> (5,)."""
    return net_forward_batched(x[None], packed)[0]


def reference_numpy(x, params):
    w1, b1, w2, b2, wfc, bfc = [np.asarray(p, np.float32) for p in params]
    x = np.asarray(x, np.float32)

    def conv1d(xx, w, b):
        cout, cin, k = w.shape
        lo = xx.shape[1] - k + 1
        out = np.zeros((cout, lo), np.float32)
        for kk in range(k):
            out += w[:, :, kk] @ xx[:, kk:kk + lo]
        return out + b[:, None]

    r1 = np.maximum(conv1d(x, w1, b1), 0.0)
    r2 = np.maximum(conv1d(x, w2, b2), 0.0)
    m1 = r1.max(axis=1)                 # pool 51
    m2 = r2.max(axis=1)                 # pool 50
    m3 = r2[:, :L2 - 1].max(axis=1)     # pool 49 (single window, drops the last position)
    feat = np.concatenate([m1, m2, m3], axis=0)
    logits = wfc @ feat + bfc
    z = logits - logits.max()
    e = np.exp(z)
    return e / e.sum()


if __name__ == "__main__":
    key = jax.random.PRNGKey(0)
    kx, k1, k2, k3, k4, k5, k6, k7, k8 = jax.random.split(key, 9)

    B = 3                                   # odd batch: exercises the zero-padded last block
    xb = jax.random.normal(kx, (B, C_IN, L), jnp.float32)

    # deterministic synthetic parameters (shapes from Net.__init__)
    w1 = jax.random.normal(k1, (N_FILT, C_IN, 2), jnp.float32) * 0.05
    b1 = jax.random.normal(k2, (N_FILT,), jnp.float32) * 0.05
    w2 = jax.random.normal(k3, (N_FILT, C_IN, 3), jnp.float32) * 0.05
    b2 = jax.random.normal(k4, (N_FILT,), jnp.float32) * 0.05
    # TODO(synk): conv3 (Conv1d(100,20,4)) is defined in Net.__init__ but never used in forward();
    # params created only for shape parity and not passed to the kernel.
    w3 = jax.random.normal(k5, (N_FILT, C_IN, 4), jnp.float32) * 0.05
    b3 = jax.random.normal(k6, (N_FILT,), jnp.float32) * 0.05
    wfc = jax.random.normal(k7, (N_CLASSES, 3 * N_FILT), jnp.float32) * 0.1
    bfc = jax.random.normal(k8, (N_CLASSES,), jnp.float32) * 0.1

    params = (w1, b1, w2, b2, wfc, bfc)
    packed = pack_params(params)            # hoisted: packed once, reused across calls

    out_b = jax.block_until_ready(net_forward_batched(xb, packed, spb=2))
    out_1 = jax.block_until_ready(net_forward(xb[0], packed))

    ref_b = np.stack([reference_numpy(np.asarray(xb[i]), params) for i in range(B)])
    # tolerance slightly relaxed vs exact division: softmax denominator uses the EUP approx reciprocal
    np.testing.assert_allclose(np.asarray(out_b), ref_b, rtol=2e-3, atol=5e-4)
    np.testing.assert_allclose(np.asarray(out_1), ref_b[0], rtol=2e-3, atol=5e-4)
    print("KERNEL_OK")
</pallas_src>

<mosaic_0001>
module attributes {stable_mosaic.version = 11 : i64} {
  func.func @net_kernel(%arg0: i32, %arg1: memref<100x128xf32, #tpu.memory_space<vmem>>, %arg2: memref<100x100xf32, #tpu.memory_space<vmem>>, %arg3: memref<40x1xf32, #tpu.memory_space<vmem>>, %arg4: memref<61x5xf32, #tpu.memory_space<vmem>>, %arg5: memref<1x2x5xf32, #tpu.memory_space<vmem>>) attributes {dimension_semantics = [#tpu.dimension_semantics<parallel>], iteration_bounds = array<i64: 2>, scalar_prefetch = 0 : i64, scratch_operands = 0 : i64, tpu.core_type = #tpu.core_type<tc>, window_params = [{transform_indices = @transform_0, window_bounds = array<i64: 100, 128>}, {pipeline_mode = #tpu.pipeline_mode<synchronous>, transform_indices = @transform_1, window_bounds = array<i64: 100, 100>}, {pipeline_mode = #tpu.pipeline_mode<synchronous>, transform_indices = @transform_2, window_bounds = array<i64: 40, 1>}, {pipeline_mode = #tpu.pipeline_mode<synchronous>, transform_indices = @transform_3, window_bounds = array<i64: 61, 5>}, {transform_indices = @transform_4, window_bounds = array<i64: 1, 2, 5>}]} {
    %c0 = arith.constant 0 : index
    %c0_0 = arith.constant 0 : index
    %0 = vector.load %arg2[%c0, %c0_0] : memref<100x100xf32, #tpu.memory_space<vmem>>, vector<100x100xf32>
    %c0_1 = arith.constant 0 : index
    %c0_2 = arith.constant 0 : index
    %1 = vector.load %arg1[%c0_1, %c0_2] : memref<100x128xf32, #tpu.memory_space<vmem>>, vector<100x128xf32>
    %cst = arith.constant dense<0.000000e+00> : vector<100x128xf32>
    %2 = tpu.matmul %0, %1, %cst {dimension_numbers = #tpu.dot_dimension_numbers<[1], [0], [0], [1], [0, 0, 1, 1], [], []>} : vector<100x100xf32>, vector<100x128xf32>, vector<100x128xf32> -> vector<100x128xf32>
    %c0_3 = arith.constant 0 : index
    %c0_4 = arith.constant 0 : index
    %3 = vector.load %arg3[%c0_3, %c0_4] : memref<40x1xf32, #tpu.memory_space<vmem>>, vector<20x1xf32>
    %c20 = arith.constant 20 : index
    %c0_5 = arith.constant 0 : index
    %4 = vector.load %arg3[%c20, %c0_5] : memref<40x1xf32, #tpu.memory_space<vmem>>, vector<20x1xf32>
    %c0_6 = arith.constant 0 : index
    %c0_7 = arith.constant 0 : index
    %5 = vector.load %arg4[%c0_6, %c0_7] : memref<61x5xf32, #tpu.memory_space<vmem>>, vector<60x5xf32>
    %c60 = arith.constant 60 : index
    %c0_8 = arith.constant 0 : index
    %6 = vector.load %arg4[%c60, %c0_8] : memref<61x5xf32, #tpu.memory_space<vmem>>, vector<1x5xf32>
    %7 = vector.extract_strided_slice %2 {offsets = [0, 0], sizes = [20, 51], strides = [1, 1]} : vector<100x128xf32> to vector<20x51xf32>
    %8 = vector.extract_strided_slice %2 {offsets = [20, 1], sizes = [20, 51], strides = [1, 1]} : vector<100x128xf32> to vector<20x51xf32>
    %9 = arith.addf %7, %8 : vector<20x51xf32>
    %10 = vector.broadcast %3 : vector<20x1xf32> to vector<20x51xf32>
    %11 = arith.addf %9, %10 : vector<20x51xf32>
    %cst_9 = arith.constant 0.000000e+00 : f32
    %12 = vector.broadcast %cst_9 : f32 to vector<20x51xf32>
    %13 = arith.maximumf %11, %12 : vector<20x51xf32>
    %cst_10 = arith.constant dense<0xFF800000> : vector<20xf32>
    %14 = vector.multi_reduction <maximumf>, %13, %cst_10 [1] : vector<20x51xf32> to vector<20xf32>
    %15 = vector.shape_cast %14 : vector<20xf32> to vector<20x1xf32>
    %16 = vector.extract_strided_slice %2 {offsets = [40, 0], sizes = [20, 50], strides = [1, 1]} : vector<100x128xf32> to vector<20x50xf32>
    %17 = vector.extract_strided_slice %2 {offsets = [60, 1], sizes = [20, 50], strides = [1, 1]} : vector<100x128xf32> to vector<20x50xf32>
    %18 = arith.addf %16, %17 : vector<20x50xf32>
    %19 = vector.extract_strided_slice %2 {offsets = [80, 2], sizes = [20, 50], strides = [1, 1]} : vector<100x128xf32> to vector<20x50xf32>
    %20 = arith.addf %18, %19 : vector<20x50xf32>
    %21 = vector.broadcast %4 : vector<20x1xf32> to vector<20x50xf32>
    %22 = arith.addf %20, %21 : vector<20x50xf32>
    %cst_11 = arith.constant 0.000000e+00 : f32
    %23 = vector.broadcast %cst_11 : f32 to vector<20x50xf32>
    %24 = arith.maximumf %22, %23 : vector<20x50xf32>
    %cst_12 = arith.constant dense<0xFF800000> : vector<20xf32>
    %25 = vector.multi_reduction <maximumf>, %24, %cst_12 [1] : vector<20x50xf32> to vector<20xf32>
    %26 = vector.shape_cast %25 : vector<20xf32> to vector<20x1xf32>
    %27 = vector.extract_strided_slice %24 {offsets = [0, 0], sizes = [20, 49], strides = [1, 1]} : vector<20x50xf32> to vector<20x49xf32>
    %cst_13 = arith.constant dense<0xFF800000> : vector<20xf32>
    %28 = vector.multi_reduction <maximumf>, %27, %cst_13 [1] : vector<20x49xf32> to vector<20xf32>
    %29 = vector.shape_cast %28 : vector<20xf32> to vector<20x1xf32>
    %30 = vector.extract_strided_slice %5 {offsets = [0, 0], sizes = [20, 5], strides = [1, 1]} : vector<60x5xf32> to vector<20x5xf32>
    %31 = vector.broadcast %15 : vector<20x1xf32> to vector<20x5xf32>
    %32 = arith.mulf %30, %31 : vector<20x5xf32>
    %33 = vector.extract_strided_slice %5 {offsets = [20, 0], sizes = [20, 5], strides = [1, 1]} : vector<60x5xf32> to vector<20x5xf32>
    %34 = vector.broadcast %26 : vector<20x1xf32> to vector<20x5xf32>
    %35 = arith.mulf %33, %34 : vector<20x5xf32>
    %36 = arith.addf %32, %35 : vector<20x5xf32>
    %37 = vector.extract_strided_slice %5 {offsets = [40, 0], sizes = [20, 5], strides = [1, 1]} : vector<60x5xf32> to vector<20x5xf32>
    %38 = vector.broadcast %29 : vector<20x1xf32> to vector<20x5xf32>
    %39 = arith.mulf %37, %38 : vector<20x5xf32>
    %40 = arith.addf %36, %39 : vector<20x5xf32>
    %cst_14 = arith.constant dense<0.000000e+00> : vector<5xf32>
    %41 = vector.multi_reduction <add>, %40, %cst_14 [0] : vector<20x5xf32> to vector<5xf32>
    %42 = vector.shape_cast %41 : vector<5xf32> to vector<1x5xf32>
    %43 = arith.addf %42, %6 : vector<1x5xf32>
    %cst_15 = arith.constant dense<0xFF800000> : vector<1xf32>
    %44 = vector.multi_reduction <maximumf>, %43, %cst_15 [1] : vector<1x5xf32> to vector<1xf32>
    %45 = vector.shape_cast %44 : vector<1xf32> to vector<1x1xf32>
    %46 = vector.broadcast %45 : vector<1x1xf32> to vector<1x5xf32>
    %47 = arith.subf %43, %46 : vector<1x5xf32>
    %48 = math.exp %47 : vector<1x5xf32>
    %cst_16 = arith.constant dense<0.000000e+00> : vector<1xf32>
    %49 = vector.multi_reduction <add>, %48, %cst_16 [1] : vector<1x5xf32> to vector<1xf32>
    %50 = vector.shape_cast %49 : vector<1xf32> to vector<1x1xf32>
    %51 = tpu.reciprocal %50 {approx = true} : vector<1x1xf32> -> vector<1x1xf32>
    %52 = vector.broadcast %51 : vector<1x1xf32> to vector<1x5xf32>
    %53 = arith.mulf %48, %52 : vector<1x5xf32>
    %c0_17 = arith.constant 0 : index
    %c0_18 = arith.constant 0 : index
    %c0_19 = arith.constant 0 : index
    %54 = vector.load %arg5[%c0_17, %c0_18, %c0_19] : memref<1x2x5xf32, #tpu.memory_space<vmem>>, vector<1x1x5xf32>
    %55 = vector.shape_cast %54 : vector<1x1x5xf32> to vector<1x5xf32>
    %56 = vector.shape_cast %53 : vector<1x5xf32> to vector<1x1x5xf32>
    tpu.vector_store %arg5[%c0_17, %c0_18, %c0_19], %56 {strides = array<i32>} : memref<1x2x5xf32, #tpu.memory_space<vmem>>, vector<1x1x5xf32>,
    %57 = vector.extract_strided_slice %2 {offsets = [0, 64], sizes = [20, 51], strides = [1, 1]} : vector<100x128xf32> to vector<20x51xf32>
    %58 = vector.extract_strided_slice %2 {offsets = [20, 65], sizes = [20, 51], strides = [1, 1]} : vector<100x128xf32> to vector<20x51xf32>
    %59 = arith.addf %57, %58 : vector<20x51xf32>
    %60 = vector.broadcast %3 : vector<20x1xf32> to vector<20x51xf32>
    %61 = arith.addf %59, %60 : vector<20x51xf32>
    %cst_20 = arith.constant 0.000000e+00 : f32
    %62 = vector.broadcast %cst_20 : f32 to vector<20x51xf32>
    %63 = arith.maximumf %61, %62 : vector<20x51xf32>
    %cst_21 = arith.constant dense<0xFF800000> : vector<20xf32>
    %64 = vector.multi_reduction <maximumf>, %63, %cst_21 [1] : vector<20x51xf32> to vector<20xf32>
    %65 = vector.shape_cast %64 : vector<20xf32> to vector<20x1xf32>
    %66 = vector.extract_strided_slice %2 {offsets = [40, 64], sizes = [20, 50], strides = [1, 1]} : vector<100x128xf32> to vector<20x50xf32>
    %67 = vector.extract_strided_slice %2 {offsets = [60, 65], sizes = [20, 50], strides = [1, 1]} : vector<100x128xf32> to vector<20x50xf32>
    %68 = arith.addf %66, %67 : vector<20x50xf32>
    %69 = vector.extract_strided_slice %2 {offsets = [80, 66], sizes = [20, 50], strides = [1, 1]} : vector<100x128xf32> to vector<20x50xf32>
    %70 = arith.addf %68, %69 : vector<20x50xf32>
    %71 = vector.broadcast %4 : vector<20x1xf32> to vector<20x50xf32>
    %72 = arith.addf %70, %71 : vector<20x50xf32>
    %cst_22 = arith.constant 0.000000e+00 : f32
    %73 = vector.broadcast %cst_22 : f32 to vector<20x50xf32>
    %74 = arith.maximumf %72, %73 : vector<20x50xf32>
    %cst_23 = arith.constant dense<0xFF800000> : vector<20xf32>
    %75 = vector.multi_reduction <maximumf>, %74, %cst_23 [1] : vector<20x50xf32> to vector<20xf32>
    %76 = vector.shape_cast %75 : vector<20xf32> to vector<20x1xf32>
    %77 = vector.extract_strided_slice %74 {offsets = [0, 0], sizes = [20, 49], strides = [1, 1]} : vector<20x50xf32> to vector<20x49xf32>
    %cst_24 = arith.constant dense<0xFF800000> : vector<20xf32>
    %78 = vector.multi_reduction <maximumf>, %77, %cst_24 [1] : vector<20x49xf32> to vector<20xf32>
    %79 = vector.shape_cast %78 : vector<20xf32> to vector<20x1xf32>
    %80 = vector.extract_strided_slice %5 {offsets = [0, 0], sizes = [20, 5], strides = [1, 1]} : vector<60x5xf32> to vector<20x5xf32>
    %81 = vector.broadcast %65 : vector<20x1xf32> to vector<20x5xf32>
    %82 = arith.mulf %80, %81 : vector<20x5xf32>
    %83 = vector.extract_strided_slice %5 {offsets = [20, 0], sizes = [20, 5], strides = [1, 1]} : vector<60x5xf32> to vector<20x5xf32>
    %84 = vector.broadcast %76 : vector<20x1xf32> to vector<20x5xf32>
    %85 = arith.mulf %83, %84 : vector<20x5xf32>
    %86 = arith.addf %82, %85 : vector<20x5xf32>
    %87 = vector.extract_strided_slice %5 {offsets = [40, 0], sizes = [20, 5], strides = [1, 1]} : vector<60x5xf32> to vector<20x5xf32>
    %88 = vector.broadcast %79 : vector<20x1xf32> to vector<20x5xf32>
    %89 = arith.mulf %87, %88 : vector<20x5xf32>
    %90 = arith.addf %86, %89 : vector<20x5xf32>
    %cst_25 = arith.constant dense<0.000000e+00> : vector<5xf32>
    %91 = vector.multi_reduction <add>, %90, %cst_25 [0] : vector<20x5xf32> to vector<5xf32>
    %92 = vector.shape_cast %91 : vector<5xf32> to vector<1x5xf32>
    %93 = arith.addf %92, %6 : vector<1x5xf32>
    %cst_26 = arith.constant dense<0xFF800000> : vector<1xf32>
    %94 = vector.multi_reduction <maximumf>, %93, %cst_26 [1] : vector<1x5xf32> to vector<1xf32>
    %95 = vector.shape_cast %94 : vector<1xf32> to vector<1x1xf32>
    %96 = vector.broadcast %95 : vector<1x1xf32> to vector<1x5xf32>
    %97 = arith.subf %93, %96 : vector<1x5xf32>
    %98 = math.exp %97 : vector<1x5xf32>
    %cst_27 = arith.constant dense<0.000000e+00> : vector<1xf32>
    %99 = vector.multi_reduction <add>, %98, %cst_27 [1] : vector<1x5xf32> to vector<1xf32>
    %100 = vector.shape_cast %99 : vector<1xf32> to vector<1x1xf32>
    %101 = tpu.reciprocal %100 {approx = true} : vector<1x1xf32> -> vector<1x1xf32>
    %102 = vector.broadcast %101 : vector<1x1xf32> to vector<1x5xf32>
    %103 = arith.mulf %98, %102 : vector<1x5xf32>
    %c0_28 = arith.constant 0 : index
    %c1 = arith.constant 1 : index
    %c0_29 = arith.constant 0 : index
    %104 = vector.load %arg5[%c0_28, %c1, %c0_29] : memref<1x2x5xf32, #tpu.memory_space<vmem>>, vector<1x1x5xf32>
    %105 = vector.shape_cast %104 : vector<1x1x5xf32> to vector<1x5xf32>
    %106 = vector.shape_cast %103 : vector<1x5xf32> to vector<1x1x5xf32>
    tpu.vector_store %arg5[%c0_28, %c1, %c0_29], %106 {strides = array<i32>} : memref<1x2x5xf32, #tpu.memory_space<vmem>>, vector<1x1x5xf32>,
    return
  }
  func.func @transform_0(%arg0: i32) -> (i32, i32) {
    %c0_i32 = arith.constant 0 : i32
    %c0_i32_0 = arith.constant 0 : i32
    return %c0_i32, %arg0 : i32, i32
  }
  func.func @transform_1(%arg0: i32) -> (i32, i32) {
    %c0_i32 = arith.constant 0 : i32
    %c0_i32_0 = arith.constant 0 : i32
    %c0_i32_1 = arith.constant 0 : i32
    return %c0_i32, %c0_i32_0 : i32, i32
  }
  func.func @transform_2(%arg0: i32) -> (i32, i32) {
    %c0_i32 = arith.constant 0 : i32
    %c0_i32_0 = arith.constant 0 : i32
    %c0_i32_1 = arith.constant 0 : i32
    return %c0_i32, %c0_i32_0 : i32, i32
  }
  func.func @transform_3(%arg0: i32) -> (i32, i32) {
    %c0_i32 = arith.constant 0 : i32
    %c0_i32_0 = arith.constant 0 : i32
    %c0_i32_1 = arith.constant 0 : i32
    return %c0_i32, %c0_i32_0 : i32, i32
  }
  func.func @transform_4(%arg0: i32) -> (i32, i32, i32) {
    %c0_i32 = arith.constant 0 : i32
    %c0_i32_0 = arith.constant 0 : i32
    %c0_i32_1 = arith.constant 0 : i32
    return %arg0, %c0_i32, %c0_i32_0 : i32, i32, i32
  }
}

</mosaic_0001>

<bundles_post_ra>
// kernel: _forward_batched.1
= control target key start
LH: loop header
LB: loop body
LE: loop exit
PB: predicated region body
PF: predicated region fallthrough
CT: control target
= control target key end

     0   :  { %9 = vsyncpa [#allocation4], 0  ;;  %s1468_s0 = inlined_call_operand.vmem [shape: f32[100,256], index: 0, kind: input, shape index: {}]   ;;  %s1469_s1 = inlined_call_operand.vmem [shape: f32[100,100], index: 1, kind: input, shape index: {}]   ;;  %s1470_s2 = inlined_call_operand.vmem [shape: f32[40,1], index: 2, kind: input, shape index: {}]   ;;  %s1471_s3 = inlined_call_operand.vmem [shape: f32[61,5], index: 3, kind: input, shape index: {}]   ;;  %s1472_s4 = inlined_call_operand.hbm [shape: f32[2,2,5], index: 4, kind: output, shape index: {}]  }
   0x1   :  { %11 = vsyncpa [#allocation4 + $0x1], 0  ;;  %s1151_s15 = smov 0   ;;  %s1153_s16 = smov 0  }
   0x2   :  { %s1155_s17 = smov 0   ;;  %s1157_s18 = smov 0  }
   0x3 LB: > { %s860_s19 = sadd.s32 4294967295, %s1118_s18   ;;  %s861_s20 = sadd.s32 4294967294, %s1118_s18   ;;  %s1118_s18 = sphi %s1157_s18, %s1480_s18   ;;  %s1114_s17 = sphi %s1155_s17, %s1479_s17   ;;  %s1110_s16 = sphi %s1153_s16, %s1478_s16   ;;  %s1106_s15 = sphi %s1151_s15, %s1477_s15  }
   0x4   : > { %s1174_s21 = sadd.s32 1, %s1118_s18   ;;  %s24_s22 = sadd.s32 1, %s1114_s17 }
   0x5   : > { %s21_s23 = ssub.s32 %s1118_s18, %s1174_s21  ;;  %p31_p0 = scmp.ne.s32.totalorder %s1114_s17, %s1110_s16 }
   0x6   : > { %p22_p1 = scmp.eq.s32.totalorder %s21_s23, 0  ;;  %p32_p2 = scmp.eq.s32.totalorder %s1118_s18, 0 }
   0x7   : > { %p124_p3 = scmp.eq.s32.totalorder %s860_s19, 1  ;;  %p129_p4 = scmp.ne.s32.totalorder %s1110_s16, %s1106_s15 }
   0x8   : > { %s1187_s24 = scalar_select %p22_p1, %s1114_s17, %s24_s22  }
   0x9   : > { %p33_p5 = por %p32_p2, %p31_p0  ;;  %p1189_p6 = por %p124_p3, %p31_p0 }
   0xa   : > { %p130_p7 = scmp.eq.s32.totalorder %s861_s20, 1  ;;  %p1473_p9 = scmp.ge.s32.totalorder %s1118_s18, 2 }
   0xc   : > { %p1193_p8 = por %p130_p7, %p129_p4  ;;  %155 = sbr.rel (%p1473_p9) target bundleno = 28 (0x1c), region = 28 }
  0x11   : > { %158 = sbr.rel (!%p33_p5) target bundleno = 28 (0x1c), region = 32  ;;  %s160_s27 = sand.u32 (%p33_p5), 1, %s1114_s17  }
  0x12   : > { %s864_s28 = sshll.u32 (%p33_p5), %s1118_s18, 3  ;;  %s1002_s29 = smul.u32 (%p33_p5), 104, %s160_s27 }
  0x13   : > { %s164_s6 = scalar_lea.vmem (%p33_p5), %s1468_s0, %s864_s28 }
  0x14   : > { %v217_v0 = vld [vmem:[%s164_s6] sm:$0xff] (%p33_p5)  ;;  %v219_v1 = vld [vmem:[%s164_s6 + $0x10] sm:$0xff] (%p33_p5)  ;;  %s162_s7 = scalar_lea.vmem (%p33_p5), [#allocation2], %s1002_s29 }
  0x15   : > { %v221_v2 = vld [vmem:[%s164_s6 + $0x20] sm:$0xff] (%p33_p5)  ;;  %v223_v3 = vld [vmem:[%s164_s6 + $0x30] sm:$0xff] (%p33_p5)  ;;  %218 = vst [vmem:[%s162_s7] sm:$0xff] (%p33_p5), %v217_v0  ;;  %220 = vst [vmem:[%s162_s7 + $0x8] sm:$0xff] (%p33_p5), %v219_v1 }
  0x16   : > { %v225_v4 = vld [vmem:[%s164_s6 + $0x40] sm:$0xff]  ;;  %v227_v5 = vld [vmem:[%s164_s6 + $0x50] sm:$0xff]  ;;  %222 = vst [vmem:[%s162_s7 + $0x10] sm:$0xff] %v221_v2  ;;  %224 = vst [vmem:[%s162_s7 + $0x18] sm:$0xff] %v223_v3 }
  0x17   : > { %226 = vst [vmem:[%s162_s7 + $0x20] sm:$0xff] %v225_v4  ;;  %228 = vst [vmem:[%s162_s7 + $0x28] sm:$0xff] %v227_v5  ;;  %v229_v6 = vld [vmem:[%s164_s6 + $0x60] sm:$0xff]  ;;  %v231_v7 = vld [vmem:[%s164_s6 + $0x70] sm:$0xff] }
  0x18   : > { %v233_v8 = vld [vmem:[%s164_s6 + $0x80] sm:$0xff]  ;;  %230 = vst [vmem:[%s162_s7 + $0x30] sm:$0xff] %v229_v6  ;;  %232 = vst [vmem:[%s162_s7 + $0x38] sm:$0xff] %v231_v7  ;;  %v235_v9 = vld [vmem:[%s164_s6 + $0x90] sm:$0xff] }
  0x19   : > { %234 = vst [vmem:[%s162_s7 + $0x40] sm:$0xff] %v233_v8  ;;  %v237_v10 = vld [vmem:[%s164_s6 + $0xa0] sm:$0xff]  ;;  %v239_v11 = vld [vmem:[%s164_s6 + $0xb0] sm:$0xff]  ;;  %236 = vst [vmem:[%s162_s7 + $0x48] sm:$0xff] %v235_v9 }
  0x1a   : > { %238 = vst [vmem:[%s162_s7 + $0x50] sm:$0xff] %v237_v10  ;;  %240 = vst [vmem:[%s162_s7 + $0x58] sm:$0xff] %v239_v11  ;;  %v241_v12 = vld [vmem:[%s164_s6 + $0xc0] sm:$0xff] }
  0x1b   : > { %242 = vst [vmem:[%s162_s7 + $0x60] sm:$0xff] %v241_v12 }
  0x1c PF: > { %p865_p10 = scmp.ge.s32.totalorder %s1118_s18, 1  ;;  %p247_p11 = scmp.lt.s32.totalorder %s1118_s18, 3 }
  0x1e   : > { %p248_p12 = pnand %p865_p10, %p247_p11 }
  0x1f   : > { %s1208_s8 = sand.u32 (!%p248_p12), 1, %s1110_s16   ;;  %s1123_s20 = smov (!%p248_p12), 127  }
  0x20   : > { %251 = sbr.rel (%p248_p12) target bundleno = 921 (0x399), region = 70  ;;  %s1124_s22 = smov (!%p248_p12), 126  }
  0x21   : > { %s1003_s9 = smul.u32 (!%p248_p12), 104, %s1208_s8  ;;  %s866_s30 = sshll.u32 (!%p248_p12), %s1208_s8, 1 }
  0x22   : > { %s882_s5 = sshll.u32 (!%p248_p12), %s860_s19, 5  ;;  %s278_s6 = scalar_lea.vmem (!%p248_p12), [#allocation3], %s866_s30 }
  0x23   : > { %s1217_s10 = scalar_lea.vmem (!%p248_p12), [#allocation2], %s1003_s9  ;;  %s796_s7 = sshll.u32 (!%p248_p12), %s278_s6, 4  ;;  %s797_s7 = int_to_ptr.vmem [resolvable:$true] %s796_s7 }
  0x24   : > { %s794_s11 = scalar_lea.hbm (!%p248_p12), %s1472_s4, %s882_s5  ;;  %s783_s12 = scalar_lea.sflag (!%p248_p12), [#allocation4], %s1208_s8 }
  0x25   : > { %v1120_v13 = vmov 0.0   ;;  %vm345_vm0 = vcmask 1043456   ;;  %vm1121_vm1 = vmmov 0   ;;  %v1122_v14 = vmov 0   ;;  %v304_v15 = vld [vmem:[%s1217_s10 + $0x60] sm:$0xf] }
  0x26   : > { %976 = vmatprep.subr.mxu1 %v1120_v13  ;;  %911 = vmatprep.subr.mxu0 %v1120_v13  ;;  %v303_v16 = vld [vmem:[%s1217_s10 + $0x58] sm:$0xff]  ;;  %v302_v17 = vld [vmem:[%s1217_s10 + $0x50] sm:$0xff]  ;;  %v301_v18 = vld [vmem:[%s1217_s10 + $0x48] sm:$0xff]  ;;  %vm305_vm2 = vcmask 818176   ;;  %vm602_vm3 = vcmask 408576   ;;  %vm699_vm4 = vcmask 933376  }
  0x27   : > { %958 = vmatprep.mubr.msk.f32.mxu1 %vm1121_vm1, %v1120_v13  ;;  %937 = vmatprep.mubr.msk.f32.mxu0 %vm1121_vm1, %v1120_v13  ;;  %v300_v19 = vld [vmem:[%s1217_s10 + $0x40] sm:$0xff]  ;;  %v299_v20 = vld [vmem:[%s1217_s10 + $0x38] sm:$0xff]  ;;  %v298_v21 = vld [vmem:[%s1217_s10 + $0x30] sm:$0xff]  ;;  %vm613_vm5 = vcmask 400384   ;;  %vm535_vm6 = vcmask 416768   ;;  %vm688_vm7 = vcmask 941568  }
  0x28   : > { %1048 = vset.pattern.permute.xlu0 %v1122_v14  ;;  %1049 = vset.pattern.permute.xlu1 %v1122_v14  ;;  %v297_v22 = vld [vmem:[%s1217_s10 + $0x28] sm:$0xff]  ;;  %v296_v23 = vld [vmem:[%s1217_s10 + $0x20] sm:$0xff]  ;;  %v295_v24 = vld [vmem:[%s1217_s10 + $0x18] sm:$0xff]  ;;  %vm542_vm8 = vcmask 412672   ;;  %vm706_vm9 = vcmask 929280   ;;  %vm609_vm10 = vcmask 404480  }
  0x29   : > { %989 = vmatpush3.msk.msra.mxu1 %vm345_vm0, %v304_v15  ;;  %912 = vmatpush3.msk.msra.mxu0 %vm345_vm0, %v304_v15  ;;  %v294_v25 = vld [vmem:[%s1217_s10 + $0x10] sm:$0xff]  ;;  %v293_v26 = vld [vmem:[%s1217_s10 + $0x8] sm:$0xff]  ;;  %v292_v27 = vld [vmem:[%s1217_s10] sm:$0xff]  ;;  %vm695_vm11 = vcmask 937472   ;;  %vm710_vm12 = vcmask 925184   ;;  %vm717_vm13 = vcmask 921088  }
  0x2a   : > { %977 = vmatprep.subr.mxu1 %v1120_v13  ;;  %913 = vmatprep.subr.mxu0 %v1120_v13  ;;  %v286_v28 = vld [vmem:[%s1469_s1 + $0x38] sm:$0xff]  ;;  %v279_v29 = vld [vmem:[%s1469_s1] sm:$0xff]  ;;  %v280_v33 = vld [vmem:[%s1469_s1 + $0x8] sm:$0xff]  ;;  %vm620_vm14 = vcmask 396288   ;;  %vm665_vm15 = vcmask 35840   ;;  %s1058_s13 = scalar_lea.vmem %s797_s7, 32 }
  0x2b   : > { %990 = vmatpush3.msra.mxu1 %v303_v16  ;;  %914 = vmatpush3.msra.mxu0 %v303_v16  ;;  %v482_v30 = vld [vmem:[%s1470_s2 + $0x14] sm:$0xff]  ;;  %v484_v31 = vld [vmem:[%s1470_s2 + $0x24] sm:$0xf]  ;;  %v483_v34 = vld [vmem:[%s1470_s2 + $0x1c] sm:$0xff]  ;;  %p1059_p13 = scmp.ne.s32.totalorder %s797_s7, %s1058_s13  ;;  %s1125_s19 = smov [#allocation3]  }
  0x2c   : > { %978 = vmatprep.subr.mxu1 %v1120_v13  ;;  %915 = vmatprep.subr.mxu0 %v1120_v13  ;;  %v287_v32 = vld [vmem:[%s1469_s1 + $0x40] sm:$0xff]  ;;  %v288_v36 = vld [vmem:[%s1469_s1 + $0x48] sm:$0xff]  ;;  %v281_v37 = vld [vmem:[%s1469_s1 + $0x10] sm:$0xff]  ;;  %s1062_s14 = sshll.u32 %s1125_s19, 4  ;;  %s1063_s14 = int_to_ptr.vmem [resolvable:$false] %s1062_s14 }
  0x2d   : > { %991 = vmatpush3.msra.mxu1 %v302_v17  ;;  %916 = vmatpush3.msra.mxu0 %v302_v17  ;;  %v479_v35 = vld [vmem:[%s1470_s2] sm:$0xff]  ;;  %v480_v38 = vld [vmem:[%s1470_s2 + $0x8] sm:$0xff]  ;;  %v289_v39 = vld [vmem:[%s1469_s1 + $0x50] sm:$0xff]  ;;  %p1060_p0 = pnand %p1059_p13, %p1189_p6  ;;  %p1065_p2 = scmp.lt.s32.totalorder %s797_s7, %s1063_s14 }
  0x2e   : > { %979 = vmatprep.subr.mxu1 %v1120_v13  ;;  %917 = vmatprep.subr.mxu0 %v1120_v13  ;;  %v282_v40 = vld [vmem:[%s1469_s1 + $0x18] sm:$0xff]  ;;  %v283_v42 = vld [vmem:[%s1469_s1 + $0x20] sm:$0xff]  ;;  %v284_v44 = vld [vmem:[%s1469_s1 + $0x28] sm:$0xff] }
  0x2f   : > { %992 = vmatpush3.msra.mxu1 %v301_v18  ;;  %918 = vmatpush3.msra.mxu0 %v301_v18  ;;  %v290_v41 = vld [vmem:[%s1469_s1 + $0x58] sm:$0xff]  ;;  %v291_v43 = vld [vmem:[%s1469_s1 + $0x60] sm:$0xf]  ;;  %v285_v45 = vld [vmem:[%s1469_s1 + $0x30] sm:$0xff]  ;;  %p1061_p1 = pneg %p1060_p0 }
  0x30   : > { %980 = vmatprep.subr.mxu1 %v1120_v13  ;;  %919 = vmatprep.subr.mxu0 %v1120_v13  ;;  %v481_v6 = vld [vmem:[%s1470_s2 + $0x10] sm:$0xf] }
  0x31   : > { %993 = vmatpush3.msra.mxu1 %v300_v19  ;;  %920 = vmatpush3.msra.mxu0 %v300_v19 }
  0x32   : > { %981 = vmatprep.subr.mxu1 %v1120_v13  ;;  %921 = vmatprep.subr.mxu0 %v1120_v13 }
  0x33   : > { %994 = vmatpush3.msra.mxu1 %v299_v20  ;;  %922 = vmatpush3.msra.mxu0 %v299_v20 }
  0x34   : > { %982 = vmatprep.subr.mxu1 %v1120_v13  ;;  %923 = vmatprep.subr.mxu0 %v1120_v13 }
  0x35   : > { %995 = vmatpush3.msra.mxu1 %v298_v21  ;;  %924 = vmatpush3.msra.mxu0 %v298_v21 }
  0x36   : > { %983 = vmatprep.subr.mxu1 %v1120_v13  ;;  %925 = vmatprep.subr.mxu0 %v1120_v13 }
  0x37   : > { %996 = vmatpush3.msra.mxu1 %v297_v22  ;;  %926 = vmatpush3.msra.mxu0 %v297_v22 }
  0x38   : > { %984 = vmatprep.subr.mxu1 %v1120_v13  ;;  %927 = vmatprep.subr.mxu0 %v1120_v13 }
  0x39   : > { %997 = vmatpush3.msra.mxu1 %v296_v23  ;;  %928 = vmatpush3.msra.mxu0 %v296_v23 }
  0x3a   : > { %985 = vmatprep.subr.mxu1 %v1120_v13  ;;  %929 = vmatprep.subr.mxu0 %v1120_v13 }
  0x3b   : > { %998 = vmatpush3.msra.mxu1 %v295_v24  ;;  %930 = vmatpush3.msra.mxu0 %v295_v24 }
  0x3c   : > { %986 = vmatprep.subr.mxu1 %v1120_v13  ;;  %931 = vmatprep.subr.mxu0 %v1120_v13 }
  0x3d   : > { %999 = vmatpush3.msra.mxu1 %v294_v25  ;;  %932 = vmatpush3.msra.mxu0 %v294_v25 }
  0x3e   : > { %987 = vmatprep.subr.mxu1 %v1120_v13  ;;  %933 = vmatprep.subr.mxu0 %v1120_v13 }
  0x3f   : > { %1000 = vmatpush3.msra.mxu1 %v293_v26  ;;  %934 = vmatpush3.msra.mxu0 %v293_v26 }
  0x40   : > { %988 = vmatprep.subr.mxu1 %v1120_v13  ;;  %935 = vmatprep.subr.mxu0 %v1120_v13 }
  0x41   : > { %1001 = vmatpush3.msra.mxu1 %v292_v27  ;;  %936 = vmatpush3.msra.mxu0 %v292_v27 }
  0x42   : > { %959 = vmatmul.mubr.msk.f32.vlgmr.msra.gmra.mxu1 %vm305_vm2, %v286_v28  ;;  %938 = vmatmul.mubr.msk.f32.vlgmr.msra.gmra.mxu0 %vm305_vm2, %v279_v29 }
  0x43   : > { %961 = vmatprep.mubr.msk.f32.mxu1 %vm1121_vm1, %v1120_v13  ;;  %940 = vmatprep.mubr.msk.f32.mxu0 %vm1121_vm1, %v1120_v13 }
  0x44   : > { %583 = vperm.xlu0 %1048, %v482_v30   ;;  %593 = vperm.xlu1 %1049, %v484_v31  }
  0x46   : > { %962 = vmatmul.mubr.msk.f32.gmra.mxu1 %vm305_vm2, %v287_v32  ;;  %941 = vmatmul.mubr.msk.f32.gmra.mxu0 %vm305_vm2, %v280_v33 }
  0x47   : > { %964 = vmatprep.mubr.msk.f32.mxu1 %vm1121_vm1, %v1120_v13  ;;  %943 = vmatprep.mubr.msk.f32.mxu0 %vm1121_vm1, %v1120_v13 }
  0x48   : > { %588 = vperm.xlu0 %1048, %v483_v34   ;;  %516 = vperm.xlu1 %1049, %v479_v35  }
  0x4a   : > { %965 = vmatmul.mubr.msk.f32.gmra.mxu1 %vm305_vm2, %v288_v36  ;;  %944 = vmatmul.mubr.msk.f32.gmra.mxu0 %vm305_vm2, %v281_v37 }
  0x4b   : > { %967 = vmatprep.mubr.msk.f32.mxu1 %vm1121_vm1, %v1120_v13  ;;  %946 = vmatprep.mubr.msk.f32.mxu0 %vm1121_vm1, %v1120_v13 }
  0x4c   : > { %521 = vperm.xlu0 %1048, %v480_v38  }
  0x4e   : > { %968 = vmatmul.mubr.msk.f32.gmra.mxu1 %vm305_vm2, %v289_v39  ;;  %947 = vmatmul.mubr.msk.f32.gmra.mxu0 %vm305_vm2, %v282_v40 }
  0x4f   : > { %970 = vmatprep.mubr.msk.f32.mxu1 %vm1121_vm1, %v1120_v13  ;;  %949 = vmatprep.mubr.msk.f32.mxu0 %vm1121_vm1, %v1120_v13 }
  0x52   : > { %971 = vmatmul.mubr.msk.f32.gmra.mxu1 %vm305_vm2, %v290_v41  ;;  %950 = vmatmul.mubr.msk.f32.gmra.mxu0 %vm305_vm2, %v283_v42 }
  0x53   : > { %973 = vmatprep.mubr.msk.f32.mxu1 %vm1121_vm1, %v1120_v13  ;;  %952 = vmatprep.mubr.msk.f32.mxu0 %vm1121_vm1, %v1120_v13 }
  0x56   : > { %974 = vmatmul.mubr.msk.f32.gmra.mxu1 %vm305_vm2, %v291_v43  ;;  %953 = vmatmul.mubr.msk.f32.gmra.mxu0 %vm305_vm2, %v284_v44 }
  0x57   : > { %955 = vmatprep.mubr.msk.f32.mxu0 %vm1121_vm1, %v1120_v13  ;;  %vm661_vm1 = vcmask 39936  }
  0x5a   : > { %956 = vmatmul.mubr.msk.f32.gmra.mxu0 %vm305_vm2, %v285_v45 }
  0xbf   : > { %v584_v19 = vpop.permute.xlu0 %583  ;;  %v594_v20 = vpop.permute.xlu1 %593 }
  0xc3   : > { %v589_v21 = vpop.permute.xlu0 %588  ;;  %v517_v22 = vpop.permute.xlu1 %516 }
  0xc7   : > { %v522_v23 = vpop.permute.xlu0 %521 }
 0x102   : > { %v1347_v46 = vpop.f32.mrf.mxu1  ;;  %v1349_v47 = vpop.f32.mrf.mxu0 }
 0x103   : > { %v549_v52 = vrot.slane %v1347_v46, 4 }
 0x104   : > { %v960_v48 = vpop.f32.mrf.mxu1  ;;  %v939_v49 = vpop.f32.mrf.mxu0 }
 0x106   : > { %v455_v50 = vpop.f32.mrf.mxu1  ;;  %v1351_v51 = vpop.f32.mrf.mxu0 }
 0x107   : > { %v550_v53 = vrot.slane %v455_v50, 4 }
 0x108   : > { %v963_v54 = vpop.f32.mrf.mxu1  ;;  %v942_v55 = vpop.f32.mrf.mxu0 }
 0x109   : > { %v551_v56 = vsel %vm345_vm0, %v549_v52, %v550_v53 }
 0x10a   : > { %554 = vrot.lane.b32.xlu1 %v551_v56, %s1123_s20  ;;  %v460_v57 = vpop.f32.mrf.mxu1  ;;  %v1356_v58 = vpop.f32.mrf.mxu0 }
 0x10b   : > { %v552_v59 = vrot.slane %v460_v57, 4  ;;  %v497_v9 = vrot.slane %v1356_v58, 4 }
 0x10c   : > { %v966_v60 = vpop.f32.mrf.mxu1  ;;  %v945_v61 = vpop.f32.mrf.mxu0 }
 0x10d   : > { %v553_v62 = vsel %vm345_vm0, %v550_v53, %v552_v59 }
 0x10e   : > { %558 = vrot.lane.b32.xlu1 %v552_v59, %s1123_s20  ;;  %556 = vrot.lane.b32.xlu0 %v553_v62, %s1123_s20  ;;  %v465_v63 = vpop.f32.mrf.mxu1  ;;  %v430_v0 = vpop.f32.mrf.mxu0 }
 0x10f   : > { %v498_v10 = vrot.slane %v430_v0, 4 }
 0x110   : > { %v969_v1 = vpop.f32.mrf.mxu1  ;;  %v948_v2 = vpop.f32.mrf.mxu0 }
 0x111   : > { %v499_v16 = vsel %vm345_vm0, %v497_v9, %v498_v10 }
 0x112   : > { %569 = vrot.lane.b32.xlu0 %v465_v63, %s1124_s22  ;;  %v470_v3 = vpop.f32.mrf.mxu1  ;;  %v435_v4 = vpop.f32.mrf.mxu0 }
 0x113   : > { %571 = vrot.lane.b32.xlu1 %v470_v3, %s1124_s22  ;;  %v500_v7 = vrot.slane %v435_v4, 4 }
 0x114   : > { %v972_v5 = vpop.f32.mrf.mxu1  ;;  %v951_v8 = vpop.f32.mrf.mxu0 }
 0x115   : > { %v501_v14 = vsel %vm345_vm0, %v498_v10, %v500_v7 }
 0x116   : > { %v475_v11 = vpop.f32.mrf.mxu1  ;;  %v440_v12 = vpop.f32.mrf.mxu0 }
 0x117   : > { %526 = vperm.xlu1 %1049, %v481_v6   ;;  %573 = vrot.lane.b32.xlu0 %v475_v11, %s1124_s22 }
 0x118   : > { %v975_v13 = vpop.f32.mrf.mxu1  ;;  %v954_v15 = vpop.f32.mrf.mxu0 }
 0x11a   : > { %v445_v17 = vpop.f32.mrf.mxu0 }
 0x11b   : > { %502 = vrot.lane.b32.xlu0 %v499_v16, %s1123_s20  ;;  %504 = vrot.lane.b32.xlu1 %v501_v14, %s1123_s20 }
 0x11c   : > { %v957_v18 = vpop.f32.mrf.mxu0 }
 0x11f   : > { %506 = vrot.lane.b32.xlu0 %v500_v7, %s1123_s20  ;;  %s1064_s20 = scalar_lea.vmem %s1063_s14, 64 }
 0x120   : > { %p1066_p3 = scmp.lt.s32.totalorder %s1064_s20, %s1058_s13 }
 0x122   : > { %p1067_p4 = por %p1066_p3, %p1065_p2 }
 0x124   : > { %p1068_p5 = pnand %p1067_p4, %p1061_p1 }
 0x17c   : > { %v555_v24 = vpop.permute.xlu1 %554 }
 0x17d   : > { %v563_v26 = vadd.f32 %v555_v24, %v440_v12  ;;  %v487_v24 = vld [vmem:[%s1471_s3 + $0x10] sm:$0xff] }
 0x180   : > { %v557_v25 = vpop.permute.xlu0 %556  ;;  %v559_v29 = vpop.permute.xlu1 %558 }
 0x181   : > { %v564_v36 = vadd.f32 %v557_v25, %v445_v17  ;;  %v565_v49 = vadd.f32 %v559_v29, %v1347_v46 }
 0x184   : > { %v570_v27 = vpop.permute.xlu0 %569 }
 0x185   : > { %v578_v28 = vadd.f32 %v570_v27, %v563_v26  ;;  %v572_v34 = vpop.permute.xlu1 %571 }
 0x186   : > { %v579_v39 = vadd.f32 %v572_v34, %v564_v36 }
 0x187   : > { %v596_v30 = vadd.f32 %v584_v19, %v578_v28 }
 0x188   : > { %v597_v44 = vadd.f32 %v589_v21, %v579_v39 }
 0x189   : > { %v1370_v31 = vmax.f32 %v596_v30, 0.0  ;;  %v574_v32 = vpop.permute.xlu0 %573 }
 0x18a   : > { %v600_v52 = vmax.f32 %v597_v44, 0.0  ;;  %v580_v55 = vadd.f32 %v574_v32, %v565_v49  ;;  %v489_v32 = vld [vmem:[%s1471_s3 + $0x20] sm:$0xff]  ;;  %v486_v44 = vld [vmem:[%s1471_s3 + $0x8] sm:$0xff] }
 0x18b   : > { %v603_v33 = vsel %vm602_vm3, %v1370_v31, -inf  ;;  %v700_v38 = vsel %vm699_vm4, %v1370_v31, -inf  ;;  %v614_v43 = vsel %vm613_vm5, %v1370_v31, -inf  ;;  %v711_v6 = vsel %vm710_vm12, %v1370_v31, -inf }
 0x18c   : > { %604 = vmax.xlane.f32.xlu1 %v603_v33  ;;  %v606_v60 = vsel %vm602_vm3, %v600_v52, -inf  ;;  %v598_v61 = vadd.f32 %v594_v20, %v580_v55  ;;  %v617_v4 = vsel %vm613_vm5, %v600_v52, -inf  ;;  %v714_v5 = vsel %vm710_vm12, %v600_v52, -inf  ;;  %v488_v20 = vld [vmem:[%s1471_s3 + $0x18] sm:$0xff] }
 0x18d   : > { %v503_v35 = vpop.permute.xlu0 %502 }
 0x18e   : > { %v511_v37 = vadd.f32 %v503_v35, %v1349_v47  ;;  %v601_v63 = vmax.f32 %v598_v61, 0.0 }
 0x190   : > { %v529_v40 = vadd.f32 %v517_v22, %v511_v37  ;;  %701 = vmax.xlane.f32.xlu1 %v700_v38  ;;  %v707_v1 = vsel %vm706_vm9, %v601_v63, -inf  ;;  %v610_v2 = vsel %vm609_vm10, %v601_v63, -inf  ;;  %v718_v7 = vsel %vm717_vm13, %v601_v63, -inf }
 0x191   : > { %v507_v48 = vpop.permute.xlu0 %506  ;;  %v621_v8 = vsel %vm620_vm14, %v601_v63, -inf }
 0x192   : > { %v527_v41 = vpop.permute.xlu1 %526  ;;  %v532_v42 = vmax.f32 %v529_v40, 0.0  ;;  %v513_v53 = vadd.f32 %v507_v48, %v1356_v58 }
 0x194   : > { %615 = vmax.xlane.f32.xlu1 %v614_v43  ;;  %v536_v45 = vsel %vm535_vm6, %v532_v42, -inf  ;;  %v689_v54 = vsel %vm688_vm7, %v532_v42, -inf  ;;  %v531_v59 = vadd.f32 %v527_v41, %v513_v53  ;;  %v485_v42 = vld [vmem:[%s1471_s3] sm:$0xff] }
 0x195   : > { %537 = vmax.xlane.f32.xlu0 %v536_v45 }
 0x196   : > { %v505_v47 = vpop.permute.xlu1 %504  ;;  %v534_v46 = vmax.f32 %v531_v59, 0.0 }
 0x197   : > { %v512_v50 = vadd.f32 %v505_v47, %v1351_v51  ;;  %v703_v51 = vsel %vm699_vm4, %v600_v52, -inf  ;;  %v491_v47 = vld [vmem:[%s1471_s3 + $0x30] sm:$0xff] }
 0x198   : > { %v543_v0 = vsel %vm542_vm8, %v534_v46, -inf  ;;  %v696_v3 = vsel %vm695_vm11, %v534_v46, -inf }
 0x199   : > { %v530_v56 = vadd.f32 %v522_v23, %v512_v50  ;;  %690 = vmax.xlane.f32.xlu0 %v689_v54  ;;  %v490_v54 = vld [vmem:[%s1471_s3 + $0x28] sm:$0xff] }
 0x19b   : > { %v533_v57 = vmax.f32 %v530_v56, 0.0 }
 0x19d   : > { %607 = vmax.xlane.f32.xlu0 %v606_v60  ;;  %v539_v62 = vsel %vm535_vm6, %v533_v57, -inf  ;;  %v692_v58 = vsel %vm688_vm7, %v533_v57, -inf }
 0x19e   : > { %540 = vmax.xlane.f32.xlu1 %v539_v62 }
 0x1a1   : > { %704 = vmax.xlane.f32.xlu0 %v703_v51 }
 0x1a2   : > { %693 = vmax.xlane.f32.xlu1 %v692_v58 }
 0x1a5   : > { %544 = vmax.xlane.f32.xlu0 %v543_v0  ;;  %v492_v0 = vld [vmem:[%s1471_s3 + $0x38] sm:$0xf] }
 0x1a6   : > { %708 = vmax.xlane.f32.xlu1 %v707_v1 }
 0x1a9   : > { %611 = vmax.xlane.f32.xlu0 %v610_v2 }
 0x1aa   : > { %697 = vmax.xlane.f32.xlu1 %v696_v3 }
 0x1ad   : > { %618 = vmax.xlane.f32.xlu0 %v617_v4 }
 0x1ae   : > { %715 = vmax.xlane.f32.xlu1 %v714_v5 }
 0x1b1   : > { %712 = vmax.xlane.f32.xlu0 %v711_v6 }
 0x1b2   : > { %719 = vmax.xlane.f32.xlu1 %v718_v7 }
 0x1b5   : > { %622 = vmax.xlane.f32.xlu0 %v621_v8 }
 0x215   : > { %v605_v9 = vpop.xlane.xlu1 %604 }
 0x216   : > { %v630_v17 = vrot.slane %v605_v9, 4 }
 0x218   : > { %v638_v30 = vmul.f32 %v630_v17, %v487_v24 }
 0x219   : > { %v702_v10 = vpop.xlane.xlu1 %701 }
 0x21a   : > { %v727_v19 = vrot.slane %v702_v10, 4  ;;  %v644_v41 = vrot.slane %v638_v30, 4 }
 0x21c   : > { %v735_v33 = vmul.f32 %v727_v19, %v487_v24 }
 0x21d   : > { %v616_v13 = vpop.xlane.xlu1 %615 }
 0x21e   : > { %v538_v11 = vpop.xlane.xlu0 %537  ;;  %v741_v43 = vrot.slane %v735_v33, 4  ;;  %v655_v1 = vmul.f32 %v616_v13, %v490_v54 }
 0x21f   : > { %v624_v55 = vmul.f32 %v538_v11, %v485_v42 }
 0x222   : > { %v691_v12 = vpop.xlane.xlu0 %690 }
 0x223   : > { %v721_v56 = vmul.f32 %v691_v12, %v485_v42 }
 0x226   : > { %v608_v14 = vpop.xlane.xlu0 %607 }
 0x227   : > { %v631_v15 = vrot.slane %v608_v14, 4  ;;  %v541_v16 = vpop.xlane.xlu1 %540 }
 0x228   : > { %v625_v63 = vmul.f32 %v541_v16, %v486_v44 }
 0x229   : > { %v632_v21 = vsel %vm345_vm0, %v630_v17, %v631_v15 }
 0x22a   : > { %v705_v18 = vpop.xlane.xlu0 %704  ;;  %v639_v26 = vmul.f32 %v632_v21, %v488_v20 }
 0x22b   : > { %v728_v22 = vrot.slane %v705_v18, 4  ;;  %v694_v23 = vpop.xlane.xlu1 %693 }
 0x22c   : > { %v645_v34 = vrot.slane %v639_v26, 4  ;;  %v722_v50 = vmul.f32 %v694_v23, %v486_v44 }
 0x22d   : > { %v729_v25 = vsel %vm345_vm0, %v727_v19, %v728_v22 }
 0x22e   : > { %v545_v27 = vpop.xlane.xlu0 %544  ;;  %v736_v28 = vmul.f32 %v729_v25, %v488_v20  ;;  %v646_v49 = vsel %vm345_vm0, %v644_v41, %v645_v34 }
 0x22f   : > { %v709_v29 = vpop.xlane.xlu1 %708  ;;  %v652_v58 = vadd.f32 %v646_v49, %v624_v55  ;;  %v626_v10 = vmul.f32 %v545_v27, %v487_v24 }
 0x230   : > { %v730_v31 = vrot.slane %v709_v29, 4  ;;  %v742_v37 = vrot.slane %v736_v28, 4 }
 0x231   : > { %v658_v14 = vadd.f32 %v655_v1, %v652_v58 }
 0x232   : > { %v731_v35 = vsel %vm345_vm0, %v728_v22, %v730_v31  ;;  %v612_v36 = vpop.xlane.xlu0 %611  ;;  %v743_v60 = vsel %vm345_vm0, %v741_v43, %v742_v37 }
 0x233   : > { %v633_v38 = vrot.slane %v612_v36, 4  ;;  %v698_v39 = vpop.xlane.xlu1 %697  ;;  %v737_v40 = vmul.f32 %v731_v35, %v489_v32  ;;  %v749_v3 = vadd.f32 %v743_v60, %v721_v56  ;;  %v662_v26 = vsel %vm661_vm1, %v658_v14, 0.0 }
 0x234   : > { %v723_v62 = vmul.f32 %v698_v39, %v487_v24 }
 0x235   : > { %v634_v45 = vsel %vm345_vm0, %v631_v15, %v633_v38  ;;  %v744_v48 = vrot.slane %v737_v40, 4  ;;  %v493_v40 = vld [vmem:[%s1471_s3 + $0x3c] sm:$0x1] }
 0x236   : > { %v640_v52 = vmul.f32 %v634_v45, %v489_v32  ;;  %v619_v53 = vpop.xlane.xlu0 %618 }
 0x237   : > { %v716_v57 = vpop.xlane.xlu1 %715  ;;  %v745_v59 = vsel %vm345_vm0, %v742_v37, %v744_v48  ;;  %v656_v6 = vmul.f32 %v619_v53, %v491_v47  ;;  %v751_v11 = vadd.f32 %v744_v48, %v723_v62 }
 0x238   : > { %v647_v61 = vrot.slane %v640_v52, 4  ;;  %v750_v46 = vadd.f32 %v745_v59, %v722_v50  ;;  %v753_v51 = vmul.f32 %v716_v57, %v491_v47 }
 0x23a   : > { %v648_v2 = vsel %vm345_vm0, %v645_v34, %v647_v61  ;;  %v713_v4 = vpop.xlane.xlu0 %712  ;;  %v756_v7 = vadd.f32 %v753_v51, %v750_v46  ;;  %v654_v18 = vadd.f32 %v647_v61, %v626_v10  ;;  %vm675_vm0 = vcmask 32768  }
 0x23b   : > { %v653_v5 = vadd.f32 %v648_v2, %v625_v63  ;;  %v752_v8 = vmul.f32 %v713_v4, %v490_v54  ;;  %v720_v9 = vpop.xlane.xlu1 %719 }
 0x23c   : > { %v754_v12 = vmul.f32 %v720_v9, %v492_v0  ;;  %v759_v20 = vsel %vm661_vm1, %v756_v7, 0.0 }
 0x23d   : > { %v659_v15 = vadd.f32 %v656_v6, %v653_v5  ;;  %v755_v16 = vadd.f32 %v752_v8, %v749_v3 }
 0x23e   : > { %v757_v17 = vadd.f32 %v754_v12, %v751_v11  ;;  %v623_v13 = vpop.xlane.xlu0 %622 }
 0x23f   : > { %v663_v19 = vsel %vm661_vm1, %v659_v15, 0.0  ;;  %v758_v21 = vsel %vm661_vm1, %v755_v16, 0.0  ;;  %v657_v22 = vmul.f32 %v623_v13, %v492_v0 }
 0x240   : > { %v760_v23 = vadd.f32 %v759_v20, %v758_v21  ;;  %v761_v25 = vsel %vm665_vm15, %v757_v17, 0.0  ;;  %v664_v29 = vadd.f32 %v663_v19, %v662_v26 }
 0x241   : > { %v660_v28 = vadd.f32 %v657_v22, %v654_v18 }
 0x242   : > { %v762_v24 = vadd.f32 %v761_v25, %v760_v23 }
 0x243   : > { %v666_v27 = vsel %vm665_vm15, %v660_v28, 0.0 }
 0x244   : > { %v763_v30 = vrot.slane %v762_v24, 4  ;;  %v667_v31 = vadd.f32 %v666_v27, %v664_v29 }
 0x246   : > { %v764_v32 = vadd.f32 %v763_v30, %v762_v24  ;;  %v668_v33 = vrot.slane %v667_v31, 4 }
 0x248   : > { %v669_v34 = vadd.f32 %v668_v33, %v667_v31  ;;  %v765_v35 = vrot.slane %v764_v32, 2 }
 0x24a   : > { %v766_v36 = vadd.f32 %v765_v35, %v764_v32  ;;  %v670_v37 = vrot.slane %v669_v34, 2 }
 0x24c   : > { %v767_v38 = vrot.slane %v766_v36, 1  ;;  %v671_v39 = vadd.f32 %v670_v37, %v669_v34 }
 0x24e   : > { %v768_v41 = vadd.f32 %v767_v38, %v766_v36  ;;  %v672_v42 = vrot.slane %v671_v39, 1 }
 0x250   : > { %v769_v43 = vadd.f32 %v768_v41, %v493_v40  ;;  %v673_v44 = vadd.f32 %v672_v42, %v671_v39 }
 0x252   : > { %v770_v45 = vsel %vm675_vm0, %v769_v43, -inf  ;;  %v674_v48 = vadd.f32 %v673_v44, %v493_v40 }
 0x253   : > { %771 = vmax.xlane.f32.xlu1 %v770_v45 }
 0x254   : > { %v676_v47 = vsel %vm675_vm0, %v674_v48, -inf }
 0x255   : > { %677 = vmax.xlane.f32.xlu0 %v676_v47 }
 0x2dc   : > { %v772_v49 = vpop.xlane.xlu1 %771 }
 0x2dd   : > { %v773_v50 = vsub.f32 %v769_v43, %v772_v49 }
 0x2de   : > { %v678_v52 = vpop.xlane.xlu0 %677 }
 0x2df   : > { %v774_v53 = vmul.f32 1.442695, %v773_v50  ;;  %v679_v54 = vsub.f32 %v674_v48, %v678_v52 }
 0x2e1   : > { %1050 = vpow2.f32 %v774_v53  ;;  %v680_v55 = vmul.f32 1.442695, %v679_v54 }
 0x2e3   : > { %1052 = vpow2.f32 %v680_v55 }
 0x2ee   : > { %v1051_v56 = vpop.eup %1050 }
 0x2ef   : > { %v776_v57 = vsel %vm675_vm0, %v1051_v56, 0.0 }
 0x2f0   : > { %v1053_v59 = vpop.eup %1052  ;;  %777 = vadd.xlane.f32.xlu1 %v776_v57 }
 0x2f1   : > { %v682_v60 = vsel %vm675_vm0, %v1053_v59, 0.0 }
 0x2f2   : > { %683 = vadd.xlane.f32.xlu0 %v682_v60 }
 0x379   : > { %v778_v61 = vpop.xlane.xlu1 %777 }
 0x37a   : > { %1054 = vrcp.f32 %v778_v61 }
 0x37b   : > { %v684_v62 = vpop.xlane.xlu0 %683 }
 0x37c   : > { %1056 = vrcp.f32 %v684_v62 }
 0x387   : > { %v1055_v46 = vpop.eup %1054 }
 0x388   : > { %v780_v51 = vmul.f32 %v1055_v46, %v1051_v56 }
 0x389   : > { %v1057_v63 = vpop.eup %1056 }
 0x38a   : > { %v686_v58 = vmul.f32 %v1057_v63, %v1053_v59  ;;  %781 = vst.msk [vmem:[%s278_s6 + $0x1] sm:$0x1] %vm675_vm0, %v780_v51 }
 0x38c   : > { %687 = vst.msk [vmem:[%s278_s6] sm:$0x1] %vm675_vm0, %v686_v58 }
 0x38d   : > { %1071 = shalt.err (!%p1068_p5)
}
 0x38e   : > { %s1072_s22 = scalar_lea.hbm %s794_s11, 32  ;;  %s1076_s27 = scalar_lea.hbm %s1472_s4, 64 }
 0x38f   : > { %p1073_p7 = scmp.ne.s32.totalorder %s794_s11, %s1072_s22  ;;  %p1077_p12 = scmp.lt.s32.totalorder %s794_s11, %s1472_s4 }
 0x390   : > { %p1078_p13 = scmp.lt.s32.totalorder %s1076_s27, %s1072_s22 }
 0x391   : > { %p1074_p10 = pnand %p1073_p7, %p1189_p6 }
 0x392   : > { %p1079_p0 = por %p1078_p13, %p1077_p12 }
 0x393   : > { %p1075_p11 = pneg %p1074_p10 }
 0x395   : > { %p1080_p9 = pnand %p1079_p0, %p1075_p11 }
 0x397   : > { %1083 = shalt.err (!%p1080_p9)
}
 0x398   : > { %1004 = dma.vmem_to_hbm [thread:$0]  (%p1189_p6), %s797_s7, 32, %s794_s11, %s783_s12  }
 0x399 PF: > { %s808_s30 = sand.u32 1, %s1106_s15   ;;  %p1476_p1 = scmp.ge.s32.totalorder %s1118_s18, 2 }
 0x39a   : > { %s809_s5 = scalar_lea.sflag [#allocation4], %s808_s30 }
 0x39b   : > { %p1007_p2 = pnand %p1476_p1, %p1193_p8 }
 0x39d   : > { %p1008_p3 = pneg %p1007_p2 }
 0x39f   : > { %1101 = dma.done.wait (%p1008_p3), %s809_s5, 32  }
 0x3a0   : > { %1103 = vsyncadd (%p1008_p3), %s809_s5, 4294967264  ;;  %p14_p9 = scmp.ge.s32.totalorder %s1174_s21, 4   ;;  %s1477_s15 = smov %s1110_s16 }
 0x3a1   : > { %s1478_s16 = smov %s1114_s17  ;;  %s1479_s17 = smov %s1187_s24 }
 0x3a2   : > { %s1480_s18 = smov %s1174_s21  ;;  %16 = sbr.rel (!%p14_p9) target bundleno = 3 (0x3), region = 114 }
 0x3a7   :  { %814 = vsyncpa [#allocation4], 1 }
 0x3a8   :  { %816 = vsyncpa [#allocation4 + $0x1], 1 }

</bundles_post_ra>
